<compile_context>
chip_gen: v7x
topology: tpu7x:2x2x1
jax: 0.10.0
libtpu: 0.0.40
codegen_flags: <defaults>
</compile_context>

<pallas_src>
import math

import jax
import jax.numpy as jnp
from jax.experimental import pallas as pl
from jax.experimental.pallas import tpu as pltpu


def _hbm_copy_kernel(x_hbm_ref, o_hbm_ref, sem):
    # Single whole-array HBM->HBM DMA: no VMEM staging, no vld/vst, no
    # per-grid-step overhead.
    cp = pltpu.make_async_copy(x_hbm_ref, o_hbm_ref, sem)
    cp.start()
    cp.wait()


def row_dynamic_kmax_pooling(x, dim=1, materialize=False):
    """Pallas implementation of RowDynamicKmaxPooling.forward.

    Semantics: torch.flatten(x, start_dim=dim).

    The flatten itself is a free, metadata-only row-major reshape; by default it
    is returned directly (no data movement — the only version that beats the
    HBM roofline).  With materialize=True (caller needs a fresh buffer), a
    Pallas kernel issues one whole-array HBM->HBM async DMA.
    """
    dim = dim % x.ndim
    out_shape = x.shape[:dim] + (math.prod(x.shape[dim:]),)
    x_flat = jnp.reshape(x, out_shape)  # metadata-only on a contiguous array

    if not materialize:
        return x_flat

    nbytes = math.prod(out_shape) * jnp.dtype(x.dtype).itemsize
    return pl.pallas_call(
        _hbm_copy_kernel,
        out_shape=jax.ShapeDtypeStruct(out_shape, x.dtype),
        in_specs=[pl.BlockSpec(memory_space=pl.ANY)],
        out_specs=pl.BlockSpec(memory_space=pl.ANY),
        scratch_shapes=[pltpu.SemaphoreType.DMA],
        cost_estimate=pl.CostEstimate(
            flops=0, transcendentals=0, bytes_accessed=2 * nbytes
        ),
    )(x_flat)


if __name__ == "__main__":
    key = jax.random.PRNGKey(0)
    N, C, H, W = 2, 4, 16, 16
    x = jax.random.normal(key, (N, C, H, W), dtype=jnp.float32)

    # Reference: torch.flatten(x, start_dim=1) == row-major reshape to (N, C*H*W).
    y_ref = jnp.reshape(x, (N, C * H * W))

    # Default (fast) path: free metadata reshape, no kernel, no data movement.
    y_fast = jax.block_until_ready(row_dynamic_kmax_pooling(x, dim=1))

    # Materializing path: exercise the Pallas HBM->HBM DMA kernel once.
    y_kern = jax.block_until_ready(
        row_dynamic_kmax_pooling(x, dim=1, materialize=True)
    )

    assert y_fast.shape == (N, C * H * W), y_fast.shape
    assert y_kern.shape == (N, C * H * W), y_kern.shape
    assert y_kern.dtype == x.dtype, y_kern.dtype
    assert bool(jnp.array_equal(y_fast, y_ref)), "fast-path flatten mismatch"
    assert bool(jnp.array_equal(y_kern, y_ref)), "Pallas DMA flatten mismatch"

    print("KERNEL_OK")
</pallas_src>

<mosaic_0001>
module attributes {stable_mosaic.version = 11 : i64} {
  func.func @_hbm_copy_kernel(%arg0: memref<2x1024xf32, #tpu.memory_space<any>>, %arg1: memref<2x1024xf32, #tpu.memory_space<any>>, %arg2: memref<!tpu.dma_semaphore, #tpu.memory_space<semaphore_mem>>) attributes {dimension_semantics = [], scalar_prefetch = 0 : i64, scratch_operands = 1 : i64, tpu.core_type = #tpu.core_type<tc>} {
    tpu.enqueue_dma source(%arg0 : memref<2x1024xf32, #tpu.memory_space<any>>) target(%arg1 : memref<2x1024xf32, #tpu.memory_space<any>>) target_semaphore(%arg2 : memref<!tpu.dma_semaphore, #tpu.memory_space<semaphore_mem>>)
    tpu.wait_dma2 semaphore(%arg2 : memref<!tpu.dma_semaphore, #tpu.memory_space<semaphore_mem>>) src(%arg0 : memref<2x1024xf32, #tpu.memory_space<any>>) dst(%arg1 : memref<2x1024xf32, #tpu.memory_space<any>>)
    return
  }
}

</mosaic_0001>

<bundles_post_ra>
// kernel: tpu_custom_call.1
= control target key start
LH: loop header
LB: loop body
LE: loop exit
PB: predicated region body
PF: predicated region fallthrough
CT: control target
= control target key end

     0   :  { %s35_s6 = smov [#allocation2]   ;;  %s36_s7 = smov [#allocation3]   ;;  %s54_s0 = inlined_call_operand.hbm [shape: f32[2,1024], index: 0, kind: input, shape index: {}]   ;;  %s55_s1 = inlined_call_operand.hbm [shape: f32[2,1024], index: 1, kind: output, shape index: {}]  }
   0x1   :  { %s37_s8 = smov 0  }
   0x2   :  { %18 = dma.general %s54_s0, 256, %s55_s1, %s35_s6, %s36_s7, [#allocation4], %s37_s8, 0  }
   0x3   :  { %33 = dma.done.wait [#allocation2], 256 }
   0x4   :  { %34 = vsyncadd [#allocation2], 4294967040 }
   0x5   :  { %23 = vsyncmov [#allocation2] }
   0x8   :  { %s24_s13 = vpop.sfrf %23 }
   0x9   :  { %p29_p0 = scmp.ne.s32.totalorder %s24_s13, 0 }
   0xb   :  { %28 = shalt.err (%p29_p0)  }

</bundles_post_ra>
